<compile_context>
chip_gen: v7x
topology: tpu7x:2x2x1
jax: 0.10.0
libtpu: 0.0.40
codegen_flags: <defaults>
</compile_context>

<pallas_src>
import functools
import math

import jax
import jax.numpy as jnp
from jax.experimental import pallas as pl
from jax.experimental.pallas import tpu as pltpu

_LANES = 128


# --------------------------------------------------------------------------
# DFT matrix helpers (ortho normalisation), built once in the wrapper.
# --------------------------------------------------------------------------
def _dft_matrix(n):
    """Real/imag parts of the n-point ortho DFT matrix F[u,k]=exp(-2pi i uk/n)/sqrt(n)."""
    k = jnp.arange(n, dtype=jnp.float32)
    # reduce u*k mod n before the 2*pi multiply so angles stay in [0, 2*pi)
    kk = jnp.mod(jnp.outer(k, k), jnp.float32(n))
    ang = (-2.0 * jnp.pi / n) * kk
    scale = jnp.float32(1.0 / math.sqrt(n))
    return jnp.cos(ang) * scale, jnp.sin(ang) * scale


# --------------------------------------------------------------------------
# Fused kernel: one (n, c) volume per grid step.
#   p_ref, t_ref : (1, D, H*W)   pred / target (diff taken in-kernel)
#   fhwr/fhwi    : (H*W, H*W)    kron(F_H, F_W) real / imag (symmetric)
#   fdr/fdi      : (D, D)        F_D real / imag
#   o_ref        : (1, D, 128)   lane-folded partial sums of weight*distance
# --------------------------------------------------------------------------
def _spectral_loss_kernel(p_ref, t_ref, fhwr_ref, fhwi_ref, fdr_ref, fdi_ref,
                          o_ref, *, alpha):
    x = p_ref[0] - t_ref[0]                                   # (D, HW) f32

    # 2D ortho DFT over (H, W): right-multiply by symmetric kron(F_H, F_W).
    ar = jnp.dot(x, fhwr_ref[...], preferred_element_type=jnp.float32)
    ai = jnp.dot(x, fhwi_ref[...], preferred_element_type=jnp.float32)

    # 1D ortho DFT over D: left-multiply by F_D (complex composition).
    fdr = fdr_ref[...]
    fdi = fdi_ref[...]
    cr = (jnp.dot(fdr, ar, preferred_element_type=jnp.float32)
          - jnp.dot(fdi, ai, preferred_element_type=jnp.float32))
    ci = (jnp.dot(fdr, ai, preferred_element_type=jnp.float32)
          + jnp.dot(fdi, ar, preferred_element_type=jnp.float32))

    fd = cr * cr + ci * ci                                    # freq_distance (D, HW)

    w = jnp.sqrt(fd)
    if alpha != 1.0:                                          # trace-time branch
        w = w ** alpha

    # per-(n, c, d) max over the (H, W) plane == max over the lane axis
    m = jnp.max(w, axis=1, keepdims=True)                     # (D, 1)
    wn = jnp.where(m > 0.0, w / m, 0.0)                       # 0/0 -> 0 (torch NaN fix)
    wn = jnp.clip(wn, 0.0, 1.0)

    ws = wn * fd                                              # (D, HW)

    # fold HW -> 128 lane-partial sums so the store is a full, unmasked vst
    d_dim, hw = ws.shape
    acc = ws[:, :_LANES]
    for k in range(1, hw // _LANES):
        acc = acc + ws[:, k * _LANES:(k + 1) * _LANES]
    o_ref[0] = acc


# --------------------------------------------------------------------------
# Wrapper
# --------------------------------------------------------------------------
def spectral_loss(pred, target, *, loss_weight=1.0, alpha=1.0):
    """Focal frequency loss for (N, C, D, H, W) volumes (module defaults)."""
    n, c, d, h, w = pred.shape
    hw = h * w
    b = n * c
    assert hw % _LANES == 0, "H*W must be a multiple of 128 for this kernel"

    p2 = pred.reshape(b, d, hw).astype(jnp.float32)
    t2 = target.reshape(b, d, hw).astype(jnp.float32)

    # ortho DFT matrices: kron(F_H, F_W) for the (H, W) plane, F_D for depth
    fhr, fhi = _dft_matrix(h)
    fwr, fwi = _dft_matrix(w)
    fhwr = jnp.kron(fhr, fwr) - jnp.kron(fhi, fwi)            # (HW, HW)
    fhwi = jnp.kron(fhr, fwi) + jnp.kron(fhi, fwr)            # (HW, HW)
    fdr, fdi = _dft_matrix(d)                                 # (D, D)

    partials = pl.pallas_call(
        functools.partial(_spectral_loss_kernel, alpha=alpha),
        out_shape=jax.ShapeDtypeStruct((b, d, _LANES), jnp.float32),
        grid=(b,),
        in_specs=[
            pl.BlockSpec((1, d, hw), lambda i: (i, 0, 0)),
            pl.BlockSpec((1, d, hw), lambda i: (i, 0, 0)),
            pl.BlockSpec((hw, hw), lambda i: (0, 0)),
            pl.BlockSpec((hw, hw), lambda i: (0, 0)),
            pl.BlockSpec((d, d), lambda i: (0, 0)),
            pl.BlockSpec((d, d), lambda i: (0, 0)),
        ],
        out_specs=pl.BlockSpec((1, d, _LANES), lambda i: (i, 0, 0)),
        compiler_params=pltpu.CompilerParams(
            dimension_semantics=("parallel",)),
    )(p2, t2, fhwr, fhwi, fdr, fdi)

    total = n * c * d * h * w
    return jnp.float32(loss_weight) * jnp.sum(partials) / total


# --------------------------------------------------------------------------
# Pure-JAX reference (mirrors the torch module, default flags)
# --------------------------------------------------------------------------
def spectral_loss_ref(pred, target, *, loss_weight=1.0, alpha=1.0):
    axes = (2, 3, 4)
    pf = jnp.fft.fftn(pred, axes=axes, norm='ortho')
    tf = jnp.fft.fftn(target, axes=axes, norm='ortho')
    dr = pf.real - tf.real
    di = pf.imag - tf.imag
    fd = dr * dr + di * di
    wmat = jnp.sqrt(fd) ** alpha
    m = jnp.max(wmat, axis=(3, 4), keepdims=True)             # per (N, C, D)
    wn = jnp.where(m > 0.0, wmat / m, 0.0)                    # NaN (0/0) -> 0
    wn = jnp.clip(wn, 0.0, 1.0)
    return jnp.mean(wn * fd) * loss_weight


if __name__ == "__main__":
    key = jax.random.PRNGKey(0)
    k1, k2 = jax.random.split(key)

    # small 3D volumes consistent with the module's (rank >= 5) forward:
    # (batch=2, channels=3, depth=8, h=16, w=16)
    n, c, d, h, w = 2, 3, 8, 16, 16
    pred = jax.random.uniform(k1, (n, c, d, h, w), jnp.float32)
    target = jax.random.uniform(k2, (n, c, d, h, w), jnp.float32)

    loss_fn = jax.jit(functools.partial(spectral_loss, loss_weight=1.0, alpha=1.0))
    loss = jax.block_until_ready(loss_fn(pred, target))

    ref = spectral_loss_ref(pred, target, loss_weight=1.0, alpha=1.0)
    assert jnp.allclose(loss, ref, rtol=2e-3, atol=1e-5), (loss, ref)

    print("KERNEL_OK")
</pallas_src>

<mosaic_0001>
module attributes {stable_mosaic.version = 11 : i64} {
  func.func @_spectral_loss_kernel(%arg0: i32, %arg1: memref<1x8x256xf32, #tpu.memory_space<vmem>>, %arg2: memref<1x8x256xf32, #tpu.memory_space<vmem>>, %arg3: memref<256x256xf32, #tpu.memory_space<vmem>>, %arg4: memref<256x256xf32, #tpu.memory_space<vmem>>, %arg5: memref<8x8xf32, #tpu.memory_space<vmem>>, %arg6: memref<8x8xf32, #tpu.memory_space<vmem>>, %arg7: memref<1x8x128xf32, #tpu.memory_space<vmem>>) attributes {dimension_semantics = [#tpu.dimension_semantics<parallel>], iteration_bounds = array<i64: 6>, scalar_prefetch = 0 : i64, scratch_operands = 0 : i64, tpu.core_type = #tpu.core_type<tc>, window_params = [{transform_indices = @transform_0, window_bounds = array<i64: 1, 8, 256>}, {transform_indices = @transform_1, window_bounds = array<i64: 1, 8, 256>}, {pipeline_mode = #tpu.pipeline_mode<synchronous>, transform_indices = @transform_2, window_bounds = array<i64: 256, 256>}, {pipeline_mode = #tpu.pipeline_mode<synchronous>, transform_indices = @transform_3, window_bounds = array<i64: 256, 256>}, {pipeline_mode = #tpu.pipeline_mode<synchronous>, transform_indices = @transform_4, window_bounds = array<i64: 8, 8>}, {pipeline_mode = #tpu.pipeline_mode<synchronous>, transform_indices = @transform_5, window_bounds = array<i64: 8, 8>}, {transform_indices = @transform_6, window_bounds = array<i64: 1, 8, 128>}]} {
    %c0 = arith.constant 0 : index
    %c0_0 = arith.constant 0 : index
    %c0_1 = arith.constant 0 : index
    %0 = vector.load %arg1[%c0, %c0_0, %c0_1] : memref<1x8x256xf32, #tpu.memory_space<vmem>>, vector<1x8x256xf32>
    %1 = vector.shape_cast %0 : vector<1x8x256xf32> to vector<8x256xf32>
    %c0_2 = arith.constant 0 : index
    %c0_3 = arith.constant 0 : index
    %c0_4 = arith.constant 0 : index
    %2 = vector.load %arg2[%c0_2, %c0_3, %c0_4] : memref<1x8x256xf32, #tpu.memory_space<vmem>>, vector<1x8x256xf32>
    %3 = vector.shape_cast %2 : vector<1x8x256xf32> to vector<8x256xf32>
    %4 = arith.subf %1, %3 : vector<8x256xf32>
    %c0_5 = arith.constant 0 : index
    %c0_6 = arith.constant 0 : index
    %5 = vector.load %arg3[%c0_5, %c0_6] : memref<256x256xf32, #tpu.memory_space<vmem>>, vector<256x256xf32>
    %cst = arith.constant dense<0.000000e+00> : vector<8x256xf32>
    %6 = tpu.matmul %4, %5, %cst {dimension_numbers = #tpu.dot_dimension_numbers<[1], [0], [0], [1], [0, 0, 1, 1], [], []>} : vector<8x256xf32>, vector<256x256xf32>, vector<8x256xf32> -> vector<8x256xf32>
    %c0_7 = arith.constant 0 : index
    %c0_8 = arith.constant 0 : index
    %7 = vector.load %arg4[%c0_7, %c0_8] : memref<256x256xf32, #tpu.memory_space<vmem>>, vector<256x256xf32>
    %cst_9 = arith.constant dense<0.000000e+00> : vector<8x256xf32>
    %8 = tpu.matmul %4, %7, %cst_9 {dimension_numbers = #tpu.dot_dimension_numbers<[1], [0], [0], [1], [0, 0, 1, 1], [], []>} : vector<8x256xf32>, vector<256x256xf32>, vector<8x256xf32> -> vector<8x256xf32>
    %c0_10 = arith.constant 0 : index
    %c0_11 = arith.constant 0 : index
    %9 = vector.load %arg5[%c0_10, %c0_11] : memref<8x8xf32, #tpu.memory_space<vmem>>, vector<8x8xf32>
    %c0_12 = arith.constant 0 : index
    %c0_13 = arith.constant 0 : index
    %10 = vector.load %arg6[%c0_12, %c0_13] : memref<8x8xf32, #tpu.memory_space<vmem>>, vector<8x8xf32>
    %cst_14 = arith.constant dense<0.000000e+00> : vector<8x256xf32>
    %11 = tpu.matmul %9, %6, %cst_14 {dimension_numbers = #tpu.dot_dimension_numbers<[1], [0], [0], [1], [0, 0, 1, 1], [], []>} : vector<8x8xf32>, vector<8x256xf32>, vector<8x256xf32> -> vector<8x256xf32>
    %cst_15 = arith.constant dense<0.000000e+00> : vector<8x256xf32>
    %12 = tpu.matmul %10, %8, %cst_15 {dimension_numbers = #tpu.dot_dimension_numbers<[1], [0], [0], [1], [0, 0, 1, 1], [], []>} : vector<8x8xf32>, vector<8x256xf32>, vector<8x256xf32> -> vector<8x256xf32>
    %13 = arith.subf %11, %12 : vector<8x256xf32>
    %cst_16 = arith.constant dense<0.000000e+00> : vector<8x256xf32>
    %14 = tpu.matmul %9, %8, %cst_16 {dimension_numbers = #tpu.dot_dimension_numbers<[1], [0], [0], [1], [0, 0, 1, 1], [], []>} : vector<8x8xf32>, vector<8x256xf32>, vector<8x256xf32> -> vector<8x256xf32>
    %cst_17 = arith.constant dense<0.000000e+00> : vector<8x256xf32>
    %15 = tpu.matmul %10, %6, %cst_17 {dimension_numbers = #tpu.dot_dimension_numbers<[1], [0], [0], [1], [0, 0, 1, 1], [], []>} : vector<8x8xf32>, vector<8x256xf32>, vector<8x256xf32> -> vector<8x256xf32>
    %16 = arith.addf %14, %15 : vector<8x256xf32>
    %17 = arith.mulf %13, %13 : vector<8x256xf32>
    %18 = arith.mulf %16, %16 : vector<8x256xf32>
    %19 = arith.addf %17, %18 : vector<8x256xf32>
    %20 = math.sqrt %19 : vector<8x256xf32>
    %cst_18 = arith.constant dense<0xFF800000> : vector<8xf32>
    %21 = vector.multi_reduction <maximumf>, %20, %cst_18 [1] : vector<8x256xf32> to vector<8xf32>
    %22 = vector.shape_cast %21 : vector<8xf32> to vector<8x1xf32>
    %cst_19 = arith.constant 0.000000e+00 : f32
    %23 = vector.broadcast %cst_19 : f32 to vector<8x1xf32>
    %24 = arith.cmpf ogt, %22, %23 : vector<8x1xf32>
    %25 = vector.broadcast %22 : vector<8x1xf32> to vector<8x256xf32>
    %26 = arith.divf %20, %25 : vector<8x256xf32>
    %cst_20 = arith.constant 0.000000e+00 : f32
    %27 = vector.shape_cast %24 : vector<8x1xi1> to vector<8x1xi1>
    %28 = vector.broadcast %27 : vector<8x1xi1> to vector<8x256xi1>
    %29 = vector.broadcast %cst_20 : f32 to vector<8x256xf32>
    %30 = arith.select %28, %26, %29 : vector<8x256xi1>, vector<8x256xf32>
    %cst_21 = arith.constant 0.000000e+00 : f32
    %cst_22 = arith.constant 1.000000e+00 : f32
    %31 = vector.broadcast %cst_21 : f32 to vector<8x256xf32>
    %32 = arith.maximumf %31, %30 : vector<8x256xf32>
    %33 = vector.broadcast %cst_22 : f32 to vector<8x256xf32>
    %34 = arith.minimumf %33, %32 : vector<8x256xf32>
    %35 = arith.mulf %34, %19 : vector<8x256xf32>
    %36 = vector.extract_strided_slice %35 {offsets = [0, 0], sizes = [8, 128], strides = [1, 1]} : vector<8x256xf32> to vector<8x128xf32>
    %37 = vector.extract_strided_slice %35 {offsets = [0, 128], sizes = [8, 128], strides = [1, 1]} : vector<8x256xf32> to vector<8x128xf32>
    %38 = arith.addf %36, %37 : vector<8x128xf32>
    %c0_23 = arith.constant 0 : index
    %c0_24 = arith.constant 0 : index
    %c0_25 = arith.constant 0 : index
    %39 = vector.load %arg7[%c0_23, %c0_24, %c0_25] : memref<1x8x128xf32, #tpu.memory_space<vmem>>, vector<1x8x128xf32>
    %40 = vector.shape_cast %39 : vector<1x8x128xf32> to vector<8x128xf32>
    %41 = vector.shape_cast %38 : vector<8x128xf32> to vector<1x8x128xf32>
    tpu.vector_store %arg7[%c0_23, %c0_24, %c0_25], %41 {strides = array<i32>} : memref<1x8x128xf32, #tpu.memory_space<vmem>>, vector<1x8x128xf32>,
    return
  }
  func.func @transform_0(%arg0: i32) -> (i32, i32, i32) {
    %c0_i32 = arith.constant 0 : i32
    %c0_i32_0 = arith.constant 0 : i32
    %c0_i32_1 = arith.constant 0 : i32
    return %arg0, %c0_i32, %c0_i32_0 : i32, i32, i32
  }
  func.func @transform_1(%arg0: i32) -> (i32, i32, i32) {
    %c0_i32 = arith.constant 0 : i32
    %c0_i32_0 = arith.constant 0 : i32
    %c0_i32_1 = arith.constant 0 : i32
    return %arg0, %c0_i32, %c0_i32_0 : i32, i32, i32
  }
  func.func @transform_2(%arg0: i32) -> (i32, i32) {
    %c0_i32 = arith.constant 0 : i32
    %c0_i32_0 = arith.constant 0 : i32
    %c0_i32_1 = arith.constant 0 : i32
    return %c0_i32, %c0_i32_0 : i32, i32
  }
  func.func @transform_3(%arg0: i32) -> (i32, i32) {
    %c0_i32 = arith.constant 0 : i32
    %c0_i32_0 = arith.constant 0 : i32
    %c0_i32_1 = arith.constant 0 : i32
    return %c0_i32, %c0_i32_0 : i32, i32
  }
  func.func @transform_4(%arg0: i32) -> (i32, i32) {
    %c0_i32 = arith.constant 0 : i32
    %c0_i32_0 = arith.constant 0 : i32
    %c0_i32_1 = arith.constant 0 : i32
    return %c0_i32, %c0_i32_0 : i32, i32
  }
  func.func @transform_5(%arg0: i32) -> (i32, i32) {
    %c0_i32 = arith.constant 0 : i32
    %c0_i32_0 = arith.constant 0 : i32
    %c0_i32_1 = arith.constant 0 : i32
    return %c0_i32, %c0_i32_0 : i32, i32
  }
  func.func @transform_6(%arg0: i32) -> (i32, i32, i32) {
    %c0_i32 = arith.constant 0 : i32
    %c0_i32_0 = arith.constant 0 : i32
    %c0_i32_1 = arith.constant 0 : i32
    return %arg0, %c0_i32, %c0_i32_0 : i32, i32, i32
  }
}

</mosaic_0001>

<bundles_post_ra>
// kernel: spectral_loss.1
= control target key start
LH: loop header
LB: loop body
LE: loop exit
PB: predicated region body
PF: predicated region fallthrough
CT: control target
= control target key end

     0   :  { %s1152_s21 = smov 0   ;;  %s1588_s0 = inlined_call_operand.vmem [shape: f32[6,8,256], index: 0, kind: input, shape index: {}]   ;;  %s1589_s1 = inlined_call_operand.vmem [shape: f32[6,8,256], index: 1, kind: input, shape index: {}]   ;;  %s1590_s2 = inlined_call_operand.vmem [shape: f32[256,256], index: 2, kind: input, shape index: {}]   ;;  %s1591_s3 = inlined_call_operand.vmem [shape: f32[256,256], index: 3, kind: input, shape index: {}]   ;;  %s1592_s4 = inlined_call_operand.vmem [shape: f32[8,8], index: 4, kind: input, shape index: {}]   ;;  %s1593_s5 = inlined_call_operand.vmem [shape: f32[8,8], index: 5, kind: input, shape index: {}]   ;;  %s1594_s6 = inlined_call_operand.vmem [shape: f32[6,8,128], index: 6, kind: output, shape index: {}]  }
   0x1 LB: > { %s945_s22 = sadd.s32 4294967295, %s1114_s21   ;;  %p949_p0 = scmp.ge.s32.totalorder %s1114_s21, 1  ;;  %s1114_s21 = sphi %s1152_s21, %s16_s21  }
   0x2   : > { %p222_p1 = scmp.lt.s32.totalorder %s1114_s21, 7 }
   0x4   : > { %p223_p2 = pnand %p949_p0, %p222_p1 }
   0x5   : > { %v277_v0 = vld [vmem:[%s1590_s2 + $0x8] sm:$0xff] (!%p223_p2)  ;;  %v279_v1 = vld [vmem:[%s1590_s2 + $0x18] sm:$0xff] (!%p223_p2)  ;;  %v276_v2 = vld [vmem:[%s1590_s2] sm:$0xff] (!%p223_p2)  ;;  %p1366_p3 = scmp.lt.s32.totalorder (!%p223_p2), %s945_s22, 5  ;;  %vm548_vm0 = vcmask (!%p223_p2), 64512  }
   0x6   : > { %226 = sbr.rel (%p223_p2) target bundleno = 695 (0x2b7), region = 44  ;;  %v963_v3 = vpack.c.bf16 (!%p223_p2), %v279_v1, %v277_v0  ;;  %v278_v4 = vld [vmem:[%s1590_s2 + $0x10] sm:$0xff] (!%p223_p2)  ;;  %v412_v5 = vld [vmem:[%s1591_s3 + $0x8] sm:$0xff] (!%p223_p2)  ;;  %v414_v6 = vld [vmem:[%s1591_s3 + $0x18] sm:$0xff] (!%p223_p2) }
   0x7   : > { %v965_v7 = vpack.c.bf16 (!%p223_p2), %v278_v4, %v276_v2  ;;  %v1027_v8 = vpack.c.bf16 (!%p223_p2), %v414_v6, %v412_v5  ;;  %v411_v9 = vld [vmem:[%s1591_s3] sm:$0xff] (!%p223_p2)  ;;  %v413_v10 = vld [vmem:[%s1591_s3 + $0x10] sm:$0xff] (!%p223_p2)  ;;  %v281_v11 = vld [vmem:[%s1590_s2 + $0x28] sm:$0xff] (!%p223_p2) }
   0x8   : > { %964 = vmatprep.subr.bf16.mxu0 (!%p223_p2), %v963_v3  ;;  %v1029_v12 = vpack.c.bf16 (!%p223_p2), %v413_v10, %v411_v9  ;;  %v283_v13 = vld [vmem:[%s1590_s2 + $0x38] sm:$0xff] (!%p223_p2)  ;;  %v280_v14 = vld [vmem:[%s1590_s2 + $0x20] sm:$0xff] (!%p223_p2)  ;;  %v282_v15 = vld [vmem:[%s1590_s2 + $0x30] sm:$0xff] (!%p223_p2) }
   0x9   : > { %966 = vmatpush1.bf16.msra.mxu0 (!%p223_p2), %v965_v7  ;;  %1028 = vmatprep.subr.bf16.mxu1 (!%p223_p2), %v1027_v8  ;;  %v967_v16 = vpack.c.bf16 (!%p223_p2), %v283_v13, %v281_v11  ;;  %v969_v17 = vpack.c.bf16 (!%p223_p2), %v282_v15, %v280_v14  ;;  %v416_v18 = vld [vmem:[%s1591_s3 + $0x28] sm:$0xff] (!%p223_p2)  ;;  %v418_v19 = vld [vmem:[%s1591_s3 + $0x38] sm:$0xff] (!%p223_p2)  ;;  %v415_v20 = vld [vmem:[%s1591_s3 + $0x20] sm:$0xff] (!%p223_p2) }
   0xa   : > { %1030 = vmatpush1.bf16.msra.mxu1 (!%p223_p2), %v1029_v12  ;;  %v1031_v21 = vpack.c.bf16 (!%p223_p2), %v418_v19, %v416_v18  ;;  %v417_v22 = vld [vmem:[%s1591_s3 + $0x30] sm:$0xff] (!%p223_p2)  ;;  %v285_v23 = vld [vmem:[%s1590_s2 + $0x48] sm:$0xff] (!%p223_p2)  ;;  %v287_v24 = vld [vmem:[%s1590_s2 + $0x58] sm:$0xff] (!%p223_p2) }
   0xb   : > { %968 = vmatprep.subr.bf16.mxu0 (!%p223_p2), %v967_v16  ;;  %v1033_v25 = vpack.c.bf16 (!%p223_p2), %v417_v22, %v415_v20  ;;  %v971_v26 = vpack.c.bf16 (!%p223_p2), %v287_v24, %v285_v23  ;;  %v284_v27 = vld [vmem:[%s1590_s2 + $0x40] sm:$0xff] (!%p223_p2)  ;;  %v286_v28 = vld [vmem:[%s1590_s2 + $0x50] sm:$0xff] (!%p223_p2)  ;;  %v420_v29 = vld [vmem:[%s1591_s3 + $0x48] sm:$0xff] (!%p223_p2) }
   0xc   : > { %1032 = vmatprep.subr.bf16.mxu1 (!%p223_p2), %v1031_v21  ;;  %v422_v30 = vld [vmem:[%s1591_s3 + $0x58] sm:$0xff] (!%p223_p2)  ;;  %v419_v31 = vld [vmem:[%s1591_s3 + $0x40] sm:$0xff] (!%p223_p2)  ;;  %v421_v32 = vld [vmem:[%s1591_s3 + $0x50] sm:$0xff] (!%p223_p2)  ;;  %v973_v33 = vpack.c.bf16 (!%p223_p2), %v286_v28, %v284_v27 }
   0xd   : > { %970 = vmatpush1.bf16.msra.mxu0 %v969_v17  ;;  %v1035_v34 = vpack.c.bf16 %v422_v30, %v420_v29  ;;  %v289_v35 = vld [vmem:[%s1590_s2 + $0x68] sm:$0xff]  ;;  %v291_v36 = vld [vmem:[%s1590_s2 + $0x78] sm:$0xff]  ;;  %v288_v37 = vld [vmem:[%s1590_s2 + $0x60] sm:$0xff]  ;;  %v1037_v38 = vpack.c.bf16 %v421_v32, %v419_v31  ;;  %s1597_s22 = smov (!%p1366_p3, %s945_s22), 5 }
   0xe   : > { %1034 = vmatpush1.bf16.msra.mxu1 %v1033_v25  ;;  %972 = vmatprep.subr.bf16.mxu0 %v971_v26  ;;  %v975_v39 = vpack.c.bf16 %v291_v36, %v289_v35  ;;  %v290_v40 = vld [vmem:[%s1590_s2 + $0x70] sm:$0xff]  ;;  %v424_v41 = vld [vmem:[%s1591_s3 + $0x68] sm:$0xff]  ;;  %v426_v42 = vld [vmem:[%s1591_s3 + $0x78] sm:$0xff]  ;;  %s961_s14 = sshll.u32 %s1597_s22, 4  ;;  %s954_s7 = sshll.u32 %s1597_s22, 3 }
   0xf   : > { %1036 = vmatprep.subr.bf16.mxu1 %v1035_v34  ;;  %v1039_v43 = vpack.c.bf16 %v426_v42, %v424_v41  ;;  %v423_v44 = vld [vmem:[%s1591_s3 + $0x60] sm:$0xff]  ;;  %v425_v45 = vld [vmem:[%s1591_s3 + $0x70] sm:$0xff]  ;;  %v293_v46 = vld [vmem:[%s1590_s2 + $0x88] sm:$0xff]  ;;  %v977_v48 = vpack.c.bf16 %v290_v40, %v288_v37  ;;  %s1452_s11 = scalar_lea.vmem %s1588_s0, %s961_s14  ;;  %s1460_s17 = scalar_lea.vmem %s1589_s1, %s961_s14 }
  0x10   : > { %v295_v47 = vld [vmem:[%s1590_s2 + $0x98] sm:$0xff]  ;;  %v428_v49 = vld [vmem:[%s1591_s3 + $0x88] sm:$0xff]  ;;  %v1041_v51 = vpack.c.bf16 %v425_v45, %v423_v44  ;;  %v292_v53 = vld [vmem:[%s1590_s2 + $0x80] sm:$0xff]  ;;  %s269_s10 = scalar_lea.vmem %s1594_s6, %s954_s7 }
  0x11   : > { %974 = vmatpush1.bf16.msra.mxu0 %v973_v33  ;;  %v430_v50 = vld [vmem:[%s1591_s3 + $0x98] sm:$0xff]  ;;  %v979_v52 = vpack.c.bf16 %v295_v47, %v293_v46  ;;  %v294_v54 = vld [vmem:[%s1590_s2 + $0x90] sm:$0xff]  ;;  %v427_v55 = vld [vmem:[%s1591_s3 + $0x80] sm:$0xff] }
  0x12   : > { %1038 = vmatpush1.bf16.msra.mxu1 %v1037_v38  ;;  %976 = vmatprep.subr.bf16.mxu0 %v975_v39  ;;  %v1043_v56 = vpack.c.bf16 %v430_v50, %v428_v49  ;;  %v429_v57 = vld [vmem:[%s1591_s3 + $0x90] sm:$0xff]  ;;  %v297_v58 = vld [vmem:[%s1590_s2 + $0xa8] sm:$0xff]  ;;  %v299_v59 = vld [vmem:[%s1590_s2 + $0xb8] sm:$0xff]  ;;  %v981_v62 = vpack.c.bf16 %v294_v54, %v292_v53 }
  0x13   : > { %1040 = vmatprep.subr.bf16.mxu1 %v1039_v43  ;;  %v432_v60 = vld [vmem:[%s1591_s3 + $0xa8] sm:$0xff]  ;;  %v434_v61 = vld [vmem:[%s1591_s3 + $0xb8] sm:$0xff]  ;;  %v1045_v63 = vpack.c.bf16 %v429_v57, %v427_v55  ;;  %v983_v0 = vpack.c.bf16 %v299_v59, %v297_v58  ;;  %v296_v1 = vld [vmem:[%s1590_s2 + $0xa0] sm:$0xff] }
  0x14   : > { %v298_v2 = vld [vmem:[%s1590_s2 + $0xb0] sm:$0xff]  ;;  %v431_v3 = vld [vmem:[%s1591_s3 + $0xa0] sm:$0xff]  ;;  %v1047_v4 = vpack.c.bf16 %v434_v61, %v432_v60  ;;  %v301_v6 = vld [vmem:[%s1590_s2 + $0xc8] sm:$0xff] }
  0x15   : > { %978 = vmatpush1.bf16.msra.mxu0 %v977_v48  ;;  %v433_v5 = vld [vmem:[%s1591_s3 + $0xb0] sm:$0xff]  ;;  %v303_v7 = vld [vmem:[%s1590_s2 + $0xd8] sm:$0xff]  ;;  %v436_v8 = vld [vmem:[%s1591_s3 + $0xc8] sm:$0xff]  ;;  %v985_v10 = vpack.c.bf16 %v298_v2, %v296_v1 }
  0x16   : > { %1042 = vmatpush1.bf16.msra.mxu1 %v1041_v51  ;;  %980 = vmatprep.subr.bf16.mxu0 %v979_v52  ;;  %v438_v9 = vld [vmem:[%s1591_s3 + $0xd8] sm:$0xff]  ;;  %v1049_v11 = vpack.c.bf16 %v433_v5, %v431_v3  ;;  %v987_v12 = vpack.c.bf16 %v303_v7, %v301_v6  ;;  %v300_v13 = vld [vmem:[%s1590_s2 + $0xc0] sm:$0xff]  ;;  %v302_v14 = vld [vmem:[%s1590_s2 + $0xd0] sm:$0xff] }
  0x17   : > { %1044 = vmatprep.subr.bf16.mxu1 %v1043_v56  ;;  %v435_v15 = vld [vmem:[%s1591_s3 + $0xc0] sm:$0xff]  ;;  %v1051_v16 = vpack.c.bf16 %v438_v9, %v436_v8  ;;  %v437_v17 = vld [vmem:[%s1591_s3 + $0xd0] sm:$0xff]  ;;  %v305_v18 = vld [vmem:[%s1590_s2 + $0xe8] sm:$0xff]  ;;  %v989_v22 = vpack.c.bf16 %v302_v14, %v300_v13 }
  0x18   : > { %v307_v19 = vld [vmem:[%s1590_s2 + $0xf8] sm:$0xff]  ;;  %v440_v20 = vld [vmem:[%s1591_s3 + $0xe8] sm:$0xff]  ;;  %v1053_v23 = vpack.c.bf16 %v437_v17, %v435_v15  ;;  %v304_v25 = vld [vmem:[%s1590_s2 + $0xe0] sm:$0xff] }
  0x19   : > { %982 = vmatpush1.bf16.msra.mxu0 %v981_v62  ;;  %v442_v21 = vld [vmem:[%s1591_s3 + $0xf8] sm:$0xff]  ;;  %v991_v24 = vpack.c.bf16 %v307_v19, %v305_v18  ;;  %v306_v26 = vld [vmem:[%s1590_s2 + $0xf0] sm:$0xff]  ;;  %v439_v27 = vld [vmem:[%s1591_s3 + $0xe0] sm:$0xff] }
  0x1a   : > { %1046 = vmatpush1.bf16.msra.mxu1 %v1045_v63  ;;  %984 = vmatprep.subr.bf16.mxu0 %v983_v0  ;;  %v1055_v28 = vpack.c.bf16 %v442_v21, %v440_v20  ;;  %v441_v29 = vld [vmem:[%s1591_s3 + $0xf0] sm:$0xff]  ;;  %v309_v30 = vld [vmem:[%s1590_s2 + $0x108] sm:$0xff]  ;;  %v311_v31 = vld [vmem:[%s1590_s2 + $0x118] sm:$0xff]  ;;  %v993_v34 = vpack.c.bf16 %v306_v26, %v304_v25 }
  0x1b   : > { %1048 = vmatprep.subr.bf16.mxu1 %v1047_v4  ;;  %v444_v32 = vld [vmem:[%s1591_s3 + $0x108] sm:$0xff]  ;;  %v446_v33 = vld [vmem:[%s1591_s3 + $0x118] sm:$0xff]  ;;  %v1057_v35 = vpack.c.bf16 %v441_v29, %v439_v27  ;;  %v995_v36 = vpack.c.bf16 %v311_v31, %v309_v30  ;;  %v308_v37 = vld [vmem:[%s1590_s2 + $0x100] sm:$0xff] }
  0x1c   : > { %v310_v38 = vld [vmem:[%s1590_s2 + $0x110] sm:$0xff]  ;;  %v443_v39 = vld [vmem:[%s1591_s3 + $0x100] sm:$0xff]  ;;  %v1059_v40 = vpack.c.bf16 %v446_v33, %v444_v32  ;;  %v313_v42 = vld [vmem:[%s1590_s2 + $0x128] sm:$0xff] }
  0x1d   : > { %986 = vmatpush1.bf16.msra.mxu0 %v985_v10  ;;  %v445_v41 = vld [vmem:[%s1591_s3 + $0x110] sm:$0xff]  ;;  %v315_v43 = vld [vmem:[%s1590_s2 + $0x138] sm:$0xff]  ;;  %v448_v44 = vld [vmem:[%s1591_s3 + $0x128] sm:$0xff]  ;;  %v997_v46 = vpack.c.bf16 %v310_v38, %v308_v37 }
  0x1e   : > { %1050 = vmatpush1.bf16.msra.mxu1 %v1049_v11  ;;  %988 = vmatprep.subr.bf16.mxu0 %v987_v12  ;;  %v450_v45 = vld [vmem:[%s1591_s3 + $0x138] sm:$0xff]  ;;  %v1061_v47 = vpack.c.bf16 %v445_v41, %v443_v39  ;;  %v999_v48 = vpack.c.bf16 %v315_v43, %v313_v42  ;;  %v312_v49 = vld [vmem:[%s1590_s2 + $0x120] sm:$0xff]  ;;  %v314_v50 = vld [vmem:[%s1590_s2 + $0x130] sm:$0xff] }
  0x1f   : > { %1052 = vmatprep.subr.bf16.mxu1 %v1051_v16  ;;  %v447_v51 = vld [vmem:[%s1591_s3 + $0x120] sm:$0xff]  ;;  %v1063_v52 = vpack.c.bf16 %v450_v45, %v448_v44  ;;  %v449_v53 = vld [vmem:[%s1591_s3 + $0x130] sm:$0xff]  ;;  %v317_v54 = vld [vmem:[%s1590_s2 + $0x148] sm:$0xff]  ;;  %v1001_v58 = vpack.c.bf16 %v314_v50, %v312_v49 }
  0x20   : > { %v319_v55 = vld [vmem:[%s1590_s2 + $0x158] sm:$0xff]  ;;  %v452_v56 = vld [vmem:[%s1591_s3 + $0x148] sm:$0xff]  ;;  %v1065_v59 = vpack.c.bf16 %v449_v53, %v447_v51  ;;  %v316_v61 = vld [vmem:[%s1590_s2 + $0x140] sm:$0xff] }
  0x21   : > { %990 = vmatpush1.bf16.msra.mxu0 %v989_v22  ;;  %v454_v57 = vld [vmem:[%s1591_s3 + $0x158] sm:$0xff]  ;;  %v1003_v60 = vpack.c.bf16 %v319_v55, %v317_v54  ;;  %v318_v62 = vld [vmem:[%s1590_s2 + $0x150] sm:$0xff]  ;;  %v451_v63 = vld [vmem:[%s1591_s3 + $0x140] sm:$0xff] }
  0x22   : > { %1054 = vmatpush1.bf16.msra.mxu1 %v1053_v23  ;;  %992 = vmatprep.subr.bf16.mxu0 %v991_v24  ;;  %v1067_v0 = vpack.c.bf16 %v454_v57, %v452_v56  ;;  %v453_v1 = vld [vmem:[%s1591_s3 + $0x150] sm:$0xff]  ;;  %v321_v2 = vld [vmem:[%s1590_s2 + $0x168] sm:$0xff]  ;;  %v323_v3 = vld [vmem:[%s1590_s2 + $0x178] sm:$0xff]  ;;  %v1005_v6 = vpack.c.bf16 %v318_v62, %v316_v61 }
  0x23   : > { %1056 = vmatprep.subr.bf16.mxu1 %v1055_v28  ;;  %v456_v4 = vld [vmem:[%s1591_s3 + $0x168] sm:$0xff]  ;;  %v458_v5 = vld [vmem:[%s1591_s3 + $0x178] sm:$0xff]  ;;  %v320_v7 = vld [vmem:[%s1590_s2 + $0x160] sm:$0xff]  ;;  %v1069_v8 = vpack.c.bf16 %v453_v1, %v451_v63  ;;  %v1007_v9 = vpack.c.bf16 %v323_v3, %v321_v2 }
  0x24   : > { %v322_v10 = vld [vmem:[%s1590_s2 + $0x170] sm:$0xff]  ;;  %v455_v11 = vld [vmem:[%s1591_s3 + $0x160] sm:$0xff]  ;;  %v1071_v13 = vpack.c.bf16 %v458_v5, %v456_v4  ;;  %v325_v14 = vld [vmem:[%s1590_s2 + $0x188] sm:$0xff] }
  0x25   : > { %994 = vmatpush1.bf16.msra.mxu0 %v993_v34  ;;  %v457_v12 = vld [vmem:[%s1591_s3 + $0x170] sm:$0xff]  ;;  %v327_v15 = vld [vmem:[%s1590_s2 + $0x198] sm:$0xff]  ;;  %v271_v16 = vld [vmem:[%s1452_s11 + $0x8] sm:$0xff]  ;;  %v1009_v20 = vpack.c.bf16 %v322_v10, %v320_v7 }
  0x26   : > { %1058 = vmatpush1.bf16.msra.mxu1 %v1057_v35  ;;  %996 = vmatprep.subr.bf16.mxu0 %v995_v36  ;;  %v460_v17 = vld [vmem:[%s1591_s3 + $0x188] sm:$0xff]  ;;  %v462_v18 = vld [vmem:[%s1591_s3 + $0x198] sm:$0xff]  ;;  %v1073_v22 = vpack.c.bf16 %v457_v12, %v455_v11  ;;  %v1011_v23 = vpack.c.bf16 %v327_v15, %v325_v14  ;;  %v324_v24 = vld [vmem:[%s1590_s2 + $0x180] sm:$0xff] }
  0x27   : > { %1060 = vmatprep.subr.bf16.mxu1 %v1059_v40  ;;  %v273_v19 = vld [vmem:[%s1460_s17 + $0x8] sm:$0xff]  ;;  %v326_v25 = vld [vmem:[%s1590_s2 + $0x190] sm:$0xff]  ;;  %v459_v26 = vld [vmem:[%s1591_s3 + $0x180] sm:$0xff]  ;;  %v1075_v27 = vpack.c.bf16 %v462_v18, %v460_v17 }
  0x28   : > { %v275_v21 = vsub.f32 %v271_v16, %v273_v19  ;;  %v461_v28 = vld [vmem:[%s1591_s3 + $0x190] sm:$0xff]  ;;  %v329_v29 = vld [vmem:[%s1590_s2 + $0x1a8] sm:$0xff]  ;;  %v331_v30 = vld [vmem:[%s1590_s2 + $0x1b8] sm:$0xff]  ;;  %v1013_v33 = vpack.c.bf16 %v326_v25, %v324_v24 }
  0x29   : > { %998 = vmatpush1.bf16.msra.mxu0 %v997_v46  ;;  %v464_v31 = vld [vmem:[%s1591_s3 + $0x1a8] sm:$0xff]  ;;  %v466_v32 = vld [vmem:[%s1591_s3 + $0x1b8] sm:$0xff]  ;;  %v1077_v34 = vpack.c.bf16 %v461_v28, %v459_v26  ;;  %v1015_v35 = vpack.c.bf16 %v331_v30, %v329_v29  ;;  %v328_v36 = vld [vmem:[%s1590_s2 + $0x1a0] sm:$0xff] }
  0x2a   : > { %1062 = vmatpush1.bf16.msra.mxu1 %v1061_v47  ;;  %1000 = vmatprep.subr.bf16.mxu0 %v999_v48  ;;  %v330_v37 = vld [vmem:[%s1590_s2 + $0x1b0] sm:$0xff]  ;;  %v463_v38 = vld [vmem:[%s1591_s3 + $0x1a0] sm:$0xff]  ;;  %v1079_v39 = vpack.c.bf16 %v466_v32, %v464_v31  ;;  %v333_v41 = vld [vmem:[%s1590_s2 + $0x1c8] sm:$0xff] }
  0x2b   : > { %1064 = vmatprep.subr.bf16.mxu1 %v1063_v52  ;;  %404 = vmatprep.mubr.f32.mxu0 %v275_v21  ;;  %v465_v40 = vld [vmem:[%s1591_s3 + $0x1b0] sm:$0xff]  ;;  %v335_v42 = vld [vmem:[%s1590_s2 + $0x1d8] sm:$0xff]  ;;  %v468_v43 = vld [vmem:[%s1591_s3 + $0x1c8] sm:$0xff]  ;;  %v1017_v45 = vpack.c.bf16 %v330_v37, %v328_v36 }
  0x2c   : > { %539 = vmatprep.mubr.f32.mxu1 %v275_v21  ;;  %v470_v44 = vld [vmem:[%s1591_s3 + $0x1d8] sm:$0xff]  ;;  %v1081_v46 = vpack.c.bf16 %v465_v40, %v463_v38  ;;  %v1019_v47 = vpack.c.bf16 %v335_v42, %v333_v41  ;;  %v332_v48 = vld [vmem:[%s1590_s2 + $0x1c0] sm:$0xff]  ;;  %v334_v49 = vld [vmem:[%s1590_s2 + $0x1d0] sm:$0xff] }
  0x2d   : > { %1002 = vmatpush1.bf16.msra.mxu0 %v1001_v58  ;;  %v467_v50 = vld [vmem:[%s1591_s3 + $0x1c0] sm:$0xff]  ;;  %v1083_v51 = vpack.c.bf16 %v470_v44, %v468_v43  ;;  %v469_v52 = vld [vmem:[%s1591_s3 + $0x1d0] sm:$0xff]  ;;  %v337_v53 = vld [vmem:[%s1590_s2 + $0x1e8] sm:$0xff]  ;;  %v1021_v57 = vpack.c.bf16 %v334_v49, %v332_v48 }
  0x2e   : > { %1066 = vmatpush1.bf16.msra.mxu1 %v1065_v59  ;;  %1004 = vmatprep.subr.bf16.mxu0 %v1003_v60  ;;  %v339_v54 = vld [vmem:[%s1590_s2 + $0x1f8] sm:$0xff]  ;;  %v472_v55 = vld [vmem:[%s1591_s3 + $0x1e8] sm:$0xff]  ;;  %v1085_v58 = vpack.c.bf16 %v469_v52, %v467_v50  ;;  %v336_v60 = vld [vmem:[%s1590_s2 + $0x1e0] sm:$0xff] }
  0x2f   : > { %1068 = vmatprep.subr.bf16.mxu1 %v1067_v0  ;;  %v474_v56 = vld [vmem:[%s1591_s3 + $0x1f8] sm:$0xff]  ;;  %v1023_v59 = vpack.c.bf16 %v339_v54, %v337_v53  ;;  %v338_v61 = vld [vmem:[%s1590_s2 + $0x1f0] sm:$0xff]  ;;  %v471_v63 = vld [vmem:[%s1591_s3 + $0x1e0] sm:$0xff] }
  0x30   : > { %v1087_v62 = vpack.c.bf16 %v474_v56, %v472_v55  ;;  %v473_v0 = vld [vmem:[%s1591_s3 + $0x1f0] sm:$0xff]  ;;  %v1025_v1 = vpack.c.bf16 %v338_v61, %v336_v60  ;;  %v270_v2 = vld [vmem:[%s1452_s11] sm:$0xff] }
  0x31   : > { %1006 = vmatpush1.bf16.msra.mxu0 %v1005_v6  ;;  %v272_v3 = vld [vmem:[%s1460_s17] sm:$0xff]  ;;  %v1089_v4 = vpack.c.bf16 %v473_v0, %v471_v63  ;;  %v1116_v6 = vmov 0.0  }
  0x32   : > { %1070 = vmatpush1.bf16.msra.mxu1 %v1069_v8  ;;  %1008 = vmatprep.subr.bf16.mxu0 %v1007_v9  ;;  %v274_v5 = vsub.f32 %v270_v2, %v272_v3  ;;  %v546_v10 = vld [vmem:[%s1592_s4] sm:$0xff] }
  0x33   : > { %1072 = vmatprep.subr.bf16.mxu1 %v1071_v13  ;;  %v547_v12 = vld [vmem:[%s1593_s5] sm:$0xff] }
  0x35   : > { %1010 = vmatpush1.bf16.msra.mxu0 %v1009_v20 }
  0x36   : > { %1074 = vmatpush1.bf16.msra.mxu1 %v1073_v22  ;;  %1012 = vmatprep.subr.bf16.mxu0 %v1011_v23 }
  0x37   : > { %1076 = vmatprep.subr.bf16.mxu1 %v1075_v27 }
  0x39   : > { %1014 = vmatpush1.bf16.msra.mxu0 %v1013_v33 }
  0x3a   : > { %1078 = vmatpush1.bf16.msra.mxu1 %v1077_v34  ;;  %1016 = vmatprep.subr.bf16.mxu0 %v1015_v35 }
  0x3b   : > { %1080 = vmatprep.subr.bf16.mxu1 %v1079_v39 }
  0x3d   : > { %1018 = vmatpush1.bf16.msra.mxu0 %v1017_v45 }
  0x3e   : > { %1082 = vmatpush1.bf16.msra.mxu1 %v1081_v46  ;;  %1020 = vmatprep.subr.bf16.mxu0 %v1019_v47 }
  0x3f   : > { %1084 = vmatprep.subr.bf16.mxu1 %v1083_v51 }
  0x41   : > { %1022 = vmatpush1.bf16.msra.mxu0 %v1021_v57 }
  0x42   : > { %1086 = vmatpush1.bf16.msra.mxu1 %v1085_v58  ;;  %1024 = vmatprep.subr.bf16.mxu0 %v1023_v59 }
  0x43   : > { %1088 = vmatprep.subr.bf16.mxu1 %v1087_v62 }
  0x45   : > { %1026 = vmatpush1.bf16.msra.mxu0 %v1025_v1 }
  0x46   : > { %1090 = vmatpush1.bf16.msra.mxu1 %v1089_v4 }
  0x48   : > { %405 = vmatmul.mubr.f32.vlgmr.msra.gmra.mrb[0].mxu0 %v274_v5 }
  0x49   : > { %540 = vmatmul.mubr.f32.vlgmr.msra.gmra.mrb[0].mxu1 %v274_v5  ;;  %763 = vmatprep.mubr.f32.mxu0 %v1116_v6 }
  0x4a   : > { %616 = vmatprep.mubr.f32.mxu1 %v1116_v6 }
 0x11b   : > { %v406_v7 = vpop.f32.mrb[0].mxu0 }
 0x11c   : > { %v408_v8 = vpop.f32.mrb[1].mxu0  ;;  %v541_v9 = vpop.f32.mrb[0].mxu1 }
 0x11d   : > { %552 = vmatprep.subr.mxu1 %v408_v8  ;;  %699 = vmatprep.subr.mxu0 %v408_v8  ;;  %v543_v11 = vpop.f32.mrb[1].mxu1 }
 0x11e   : > { %553 = vmatpush1.msra.mxu1 %v406_v7  ;;  %700 = vmatpush1.msra.mxu0 %v406_v7 }
 0x11f   : > { %955 = vmatmul.mubr.msk.f32.vlgmr.msra.gmra.mrb[2].mxu1 %vm548_vm0, %v546_v10  ;;  %626 = vmatprep.subr.mxu1 %v543_v11 }
 0x120   : > { %957 = vmatmul.mubr.msk.f32.vlgmr.msra.gmra.mrb[2].mxu0 %vm548_vm0, %v547_v12  ;;  %770 = vmatprep.subr.mxu0 %v543_v11 }
 0x121   : > { %627 = vmatpush1.msra.mxu1 %v541_v9  ;;  %771 = vmatpush1.msra.mxu0 %v541_v9 }
 0x122   : > { %690 = vmatprep.mubr.f32.mxu1 %v1116_v6  ;;  %834 = vmatprep.mubr.f32.mxu0 %v1116_v6 }
 0x123   : > { %956 = vmatmul.mubr.msk.f32.vlgmr.msra.gmra.mrb[4].mxu1 %vm548_vm0, %v547_v12 }
 0x128   : > { %958 = vmatmul.mubr.msk.f32.vlgmr.msra.gmra.mrb[2].mxu0 %vm548_vm0, %v546_v10 }
 0x1f2   : > { %v618_v13 = vpop.f32.mrb[2].mxu1 }
 0x1f3   : > { %v620_v14 = vpop.f32.mrb[3].mxu1 }
 0x1f6   : > { %v692_v15 = vpop.f32.mrb[4].mxu1 }
 0x1f7   : > { %v697_v16 = vsub.f32 %v618_v13, %v692_v15  ;;  %v694_v17 = vpop.f32.mrb[5].mxu1 }
 0x1f8   : > { %v698_v18 = vsub.f32 %v620_v14, %v694_v17 }
 0x1f9   : > { %v841_v20 = vmul.f32 %v697_v16, %v697_v16 }
 0x1fa   : > { %v842_v23 = vmul.f32 %v698_v18, %v698_v18 }
 0x1fb   : > { %v836_v19 = vpop.f32.mrb[2].mxu0 }
 0x1fc   : > { %v843_v21 = vmul.f32 %v836_v19, %v836_v19  ;;  %v838_v22 = vpop.f32.mrb[3].mxu0 }
 0x1fd   : > { %v844_v24 = vmul.f32 %v838_v22, %v838_v22 }
 0x1fe   : > { %v845_v25 = vadd.f32 %v843_v21, %v841_v20 }
 0x1ff   : > { %v846_v26 = vadd.f32 %v844_v24, %v842_v23 }
 0x200   : > { %1102 = vrsqrt.f32 %v845_v25  ;;  %vm849_vm1 = vcmp.eq.f32.partialorder %v845_v25, inf  ;;  %v852_v30 = vand.u32 2147483648, %v845_v25  ;;  %vm851_vm2 = vcmp.eq.f32.partialorder %v845_v25, 0.0 }
 0x201   : > { %1104 = vrsqrt.f32 %v846_v26  ;;  %vm856_vm3 = vcmp.eq.f32.partialorder %v846_v26, inf  ;;  %v859_v33 = vand.u32 2147483648, %v846_v26  ;;  %vm858_vm4 = vcmp.eq.f32.partialorder %v846_v26, 0.0 }
 0x20a   : > { %v1103_v27 = vpop.eup %1102 }
 0x20b   : > { %v1105_v28 = vpop.eup %1104  ;;  %v848_v29 = vmul.f32 %v1103_v27, %v845_v25 }
 0x20c   : > { %v855_v31 = vmul.f32 %v1105_v28, %v846_v26 }
 0x20d   : > { %v850_v32 = vsel %vm849_vm1, %v845_v25, %v848_v29 }
 0x20e   : > { %v853_v34 = vsel %vm851_vm2, %v852_v30, %v850_v32  ;;  %v857_v35 = vsel %vm856_vm3, %v846_v26, %v855_v31 }
 0x20f   : > { %v860_v36 = vsel %vm858_vm4, %v859_v33, %v857_v35 }
 0x210   : > { %v861_v37 = vmax.f32 %v853_v34, %v860_v36 }
 0x212   : > { %862 = vmax.xlane.f32.xlu0 %v861_v37 }
 0x29f   : > { %v863_v38 = vpop.xlane.xlu0 %862 }
 0x2a0   : > { %1106 = vrcp.f32 %v863_v38  ;;  %vm864_vm5 = vcmp.gt.f32.partialorder %v863_v38, 0.0 }
 0x2aa   : > { %v1107_v39 = vpop.eup %1106 }
 0x2ab   : > { %v866_v40 = vmul.f32 %v1107_v39, %v853_v34  ;;  %v867_v41 = vmul.f32 %v1107_v39, %v860_v36 }
 0x2ad   : > { %v870_v42 = vsel %vm864_vm5, %v866_v40, 0.0  ;;  %v871_v43 = vsel %vm864_vm5, %v867_v41, 0.0 }
 0x2ae   : > { %v872_v44 = vmax.f32 %v870_v42, 0.0  ;;  %v873_v45 = vmax.f32 %v871_v43, 0.0 }
 0x2b0   : > { %v874_v46 = vmin.f32 %v872_v44, 1.0  ;;  %v875_v47 = vmin.f32 %v873_v45, 1.0 }
 0x2b2   : > { %v876_v48 = vmul.f32 %v874_v46, %v845_v25  ;;  %v877_v49 = vmul.f32 %v875_v47, %v846_v26 }
 0x2b4   : > { %v878_v50 = vadd.f32 %v877_v49, %v876_v48 }
 0x2b6   : > { %879 = vst [vmem:[%s269_s10] sm:$0xff] %v878_v50 }
 0x2b7 PF: > { %s16_s21 = sadd.s32 1, %s1114_s21  }
 0x2b8   : > { %p13_p4 = scmp.ge.s32.totalorder %s16_s21, 8  }
 0x2ba   :  { %15 = sbr.rel (!%p13_p4) target bundleno = 1 (0x1), region = 77 }

</bundles_post_ra>
